<compile_context>
chip_gen: v6e
topology: v6e:2x2x1
jax: 0.10.0
libtpu: 0.0.40
codegen_flags: <defaults>
</compile_context>

<pallas_src>
import jax
import jax.numpy as jnp
from jax.experimental import pallas as pl
from jax.experimental.pallas import tpu as pltpu

_LANE = 128
_MIB = 1024 * 1024


def _transpose_kernel(x_ref, o_ref):
    # x_ref: (tm, tc) tile of the per-batch (M, C) view.
    # o_ref: (tc, tm) tile of the per-batch (C, M) view (lane-dense minor dim).
    # TODO(synk): for sub-32-bit dtypes (bf16/int8/fp8), pack M-adjacent elems
    # into u32 containers (pltpu.bitcast), transpose the u32 tile and bitcast
    # back to cut XLU relayout work; packed-layout bitcast correspondence needs
    # hardware validation, so the plain transpose is kept here.
    o_ref[...] = x_ref[...].T


def _round_up(x, m):
    return ((x + m - 1) // m) * m


def _padded_step_bytes(tm, tc, itemsize):
    """Padded VMEM bytes of one (input + output) block pair (single buffer)."""
    sub = 8 * max(1, 4 // itemsize)  # sublane granule: 8 f32, 16 bf16, 32 i8
    in_b = _round_up(tm, sub) * _round_up(tc, _LANE) * itemsize
    out_b = _round_up(tc, sub) * _round_up(tm, _LANE) * itemsize
    return in_b + out_b


def _generation_params():
    """Return (per-step traffic target, VMEM pipeline budget, vmem_limit, gen)."""
    vmem_cap = 64 * _MIB  # conservative default = v7x physical VMEM
    try:
        vmem_cap = int(pltpu.get_tpu_info().vmem_capacity_bytes)
    except Exception:
        pass
    gen = 6
    try:
        kind = jax.devices()[0].device_kind.lower()
        if "7" in kind:
            gen = 7
        elif "v6" in kind:
            gen = 6
        elif any(s in kind for s in ("v5", "v4", "v3", "v2")):
            gen = 5
    except Exception:
        pass
    # Per-step (in+out) HBM traffic target: larger on faster-HBM chips so the
    # ~0.35us per-grid-step overhead stays well amortized.
    if gen >= 7:
        target = 10 * _MIB
    elif gen == 6:
        target = 4 * _MIB
    else:
        target = 5 * _MIB // 2
    # Scoped VMEM limit: stay well inside physical VMEM (48 MiB on v7x's
    # 64 MiB, 64 MiB on v5e/v6e's 128 MiB); pipeline buffers get 8 MiB headroom.
    vmem_limit = min(64 * _MIB, (vmem_cap * 3) // 4)
    pipeline_budget = vmem_limit - 8 * _MIB
    return target, pipeline_budget, vmem_limit, gen


def _choose_tiles(N, M, C, itemsize, target_bytes, pipeline_budget, gen):
    """Pick (tm, tc): M-tile (output minor, lane-dense) and C-tile."""
    sub = 8 * max(1, 4 // itemsize)
    # Channel tile: keep full C unless even a tm=128 full-C double-buffered
    # block pair overflows the VMEM budget; then tile C in 128 multiples.
    tc = C
    if C > _LANE and 2 * _padded_step_bytes(_LANE, C, itemsize) > pipeline_budget:
        max_tc = pipeline_budget // (8 * _LANE * itemsize)
        tc = max(_LANE, (max_tc // _LANE) * _LANE)
    # M tile: hit the per-step traffic target, stay inside VMEM (with lane /
    # sublane padding accounted), keep a multiple of 128 for unmasked stores.
    if M <= _LANE:
        tm = M  # full extent: always layout-legal
    else:
        tm_target = target_bytes // max(1, 2 * tc * itemsize)
        per_row = (_round_up(tc, _LANE) + _round_up(tc, sub)) * itemsize
        tm_vmem = pipeline_budget // max(1, 2 * per_row)
        tm = max(_LANE, (min(M, tm_target, tm_vmem) // _LANE) * _LANE)
        # v7x megacore: keep >= 2 parallel grid steps so both TensorCores work.
        if gen >= 7 and N * pl.cdiv(M, tm) * pl.cdiv(C, tc) < 2 and M >= 2 * _LANE:
            tm = max(_LANE, ((M // 2) // _LANE) * _LANE)
    return tm, tc


def nhwzc_to_nchwz(x):
    """x: (N, H, W, Z, C) -> (N, C, H, W, Z); same dtype (== permute(0,4,1,2,3))."""
    N, H, W, Z, C = x.shape
    M = H * W * Z
    itemsize = jnp.dtype(x.dtype).itemsize

    # Pure reshape (no data movement): collapse the spatial dims.
    x2 = x.reshape(N, M, C)

    target, pipeline_budget, vmem_limit, gen = _generation_params()
    tm, tc = _choose_tiles(N, M, C, itemsize, target, pipeline_budget, gen)

    grid = (N, pl.cdiv(C, tc), pl.cdiv(M, tm))  # all parallel -> megacore-friendly

    # Input block: minor dim tc (full C, or a 128-multiple when C is tiled).
    # Output block: lane-dense tm minor dim -> unmasked vector stores.
    in_spec = pl.BlockSpec((pl.Squeezed(), tm, tc), lambda n, j, i: (n, i, j))
    # NOTE: if xprof shows exposed output-writeback gaps (strided writeback of
    # tc chunks of tm*itemsize), bump this spec to pipeline_mode=pl.Buffered(3).
    out_spec = pl.BlockSpec((pl.Squeezed(), tc, tm), lambda n, j, i: (n, j, i))

    y2 = pl.pallas_call(
        _transpose_kernel,
        out_shape=jax.ShapeDtypeStruct((N, C, M), x.dtype),
        grid_spec=pltpu.PrefetchScalarGridSpec(
            num_scalar_prefetch=0,
            grid=grid,
            in_specs=[in_spec],
            out_specs=out_spec,
        ),
        compiler_params=pltpu.CompilerParams(
            dimension_semantics=("parallel", "parallel", "parallel"),
            vmem_limit_bytes=vmem_limit,
        ),
        cost_estimate=pl.CostEstimate(
            flops=0,
            transcendentals=0,
            bytes_accessed=2 * N * M * C * itemsize,
        ),
    )(x2)

    # Free reshape back to the 5-D NCHWZ layout.
    return y2.reshape(N, C, H, W, Z)


if __name__ == "__main__":
    key = jax.random.PRNGKey(0)

    # Primary small shape consistent with the module's (N, H, W, Z, C) input.
    N, H, W, Z, C = 2, 4, 4, 8, 16
    x = jax.random.normal(key, (N, H, W, Z, C), dtype=jnp.float32)
    y = jax.block_until_ready(nhwzc_to_nchwz(x))
    ref = jnp.transpose(x, (0, 4, 1, 2, 3))
    assert y.shape == (N, C, H, W, Z), y.shape
    assert y.dtype == x.dtype
    assert jnp.array_equal(y, ref), "mismatch vs reference permute (f32)"

    # Ragged spatial extent (exercises partial M tiles with a cdiv grid).
    x2 = jax.random.normal(jax.random.PRNGKey(1), (1, 5, 7, 11, 24), jnp.float32)
    y2 = jax.block_until_ready(nhwzc_to_nchwz(x2))
    assert jnp.array_equal(y2, jnp.transpose(x2, (0, 4, 1, 2, 3))), "mismatch (ragged)"

    # bf16 path (packed-dtype transpose; plain XLU transpose until the u32
    # packing TODO is validated on hardware).
    x3 = jax.random.normal(jax.random.PRNGKey(2), (1, 2, 4, 32, 128)).astype(jnp.bfloat16)
    y3 = jax.block_until_ready(nhwzc_to_nchwz(x3))
    assert jnp.array_equal(y3, jnp.transpose(x3, (0, 4, 1, 2, 3))), "mismatch (bf16)"

    print("KERNEL_OK")
</pallas_src>

<mosaic_0001>
module attributes {stable_mosaic.version = 11 : i64} {
  func.func @_transpose_kernel(%arg0: i32, %arg1: i32, %arg2: i32, %arg3: memref<1x128x16xf32, #tpu.memory_space<vmem>>, %arg4: memref<1x16x128xf32, #tpu.memory_space<vmem>>) attributes {dimension_semantics = [#tpu.dimension_semantics<parallel>, #tpu.dimension_semantics<parallel>, #tpu.dimension_semantics<parallel>], iteration_bounds = array<i64: 2, 1, 1>, scalar_prefetch = 0 : i64, scratch_operands = 0 : i64, tpu.core_type = #tpu.core_type<tc>, window_params = [{transform_indices = @transform_0, window_bounds = array<i64: 1, 128, 16>}, {transform_indices = @transform_1, window_bounds = array<i64: 1, 16, 128>}]} {
    %c0 = arith.constant 0 : index
    %c0_0 = arith.constant 0 : index
    %c0_1 = arith.constant 0 : index
    %0 = vector.load %arg3[%c0, %c0_0, %c0_1] : memref<1x128x16xf32, #tpu.memory_space<vmem>>, vector<1x128x16xf32>
    %1 = vector.shape_cast %0 : vector<1x128x16xf32> to vector<128x16xf32>
    %2 = tpu.transpose %1, [1, 0] : vector<128x16xf32> -> vector<16x128xf32>
    %c0_2 = arith.constant 0 : index
    %c0_3 = arith.constant 0 : index
    %c0_4 = arith.constant 0 : index
    %3 = vector.load %arg4[%c0_2, %c0_3, %c0_4] : memref<1x16x128xf32, #tpu.memory_space<vmem>>, vector<1x16x128xf32>
    %4 = vector.shape_cast %3 : vector<1x16x128xf32> to vector<16x128xf32>
    %5 = vector.shape_cast %2 : vector<16x128xf32> to vector<1x16x128xf32>
    tpu.vector_store %arg4[%c0_2, %c0_3, %c0_4], %5 {strides = array<i32>} : memref<1x16x128xf32, #tpu.memory_space<vmem>>, vector<1x16x128xf32>,
    return
  }
  func.func @transform_0(%arg0: i32, %arg1: i32, %arg2: i32) -> (i32, i32, i32) {
    %c0_i32 = arith.constant 0 : i32
    return %arg0, %arg2, %arg1 : i32, i32, i32
  }
  func.func @transform_1(%arg0: i32, %arg1: i32, %arg2: i32) -> (i32, i32, i32) {
    %c0_i32 = arith.constant 0 : i32
    return %arg0, %arg1, %arg2 : i32, i32, i32
  }
}

</mosaic_0001>

<bundles_post_ra>
// kernel: tpu_custom_call.1
= control target key start
LH: loop header
LB: loop body
LE: loop exit
PB: predicated region body
PF: predicated region fallthrough
CT: control target
= control target key end

     0   :  { %6 = vsyncpa [#allocation3], 0  ;;  %s614_s0 = inlined_call_operand.vmem [shape: f32[2,128,16], index: 0, kind: input, shape index: {}]   ;;  %s615_s1 = inlined_call_operand.hbm [shape: f32[2,16,128], index: 1, kind: output, shape index: {}]  }
   0x1   :  { %8 = vsyncpa [#allocation3 + $0x1], 0  ;;  %s482_s6 = smov 0   ;;  %s484_s7 = smov 0  }
   0x2   :  { %s486_s8 = smov 0   ;;  %s488_s9 = smov 0  }
   0x3   :  { %s490_s10 = smov 0   ;;  %s492_s11 = smov 0  }
   0x4 LB: > { %s319_s12 = sadd.s32 4294967295, %s467_s11   ;;  %s320_s13 = sadd.s32 4294967294, %s467_s11   ;;  %s467_s11 = sphi %s492_s11, %s14_s11   ;;  %s463_s10 = sphi %s490_s10, %s622_s10   ;;  %s459_s9 = sphi %s488_s9, %s621_s9   ;;  %s455_s8 = sphi %s486_s8, %s620_s8   ;;  %s451_s7 = sphi %s484_s7, %s619_s7   ;;  %s447_s6 = sphi %s482_s6, %s618_s6  }
   0x5   : > { %s33_s14 = sadd.s32 1, %s463_s10  ;;  %s74_s15 = sadd.s32 1, %s455_s8 }
   0x6   : > { %p35_p0 = scmp.ge.s32.totalorder %s33_s14, 2  ;;  %p84_p1 = scmp.ne.s32.totalorder %s455_s8, %s451_s7 }
   0x7   : > { %p85_p2 = scmp.eq.s32.totalorder %s319_s12, 1  ;;  %p90_p3 = scmp.ne.s32.totalorder %s451_s7, %s447_s6 }
   0x8   : > { %s624_s14 = smov (%p35_p0, %s33_s14), 0  ;;  %p91_p5 = scmp.eq.s32.totalorder %s320_s13, 1 }
   0x9   : > { %p522_p4 = por %p85_p2, %p84_p1  ;;  %s67_s17 = ssub.s32 %s463_s10, %s624_s14 }
   0xa   : > { %p323_p6 = scmp.ge.s32.totalorder %s467_s11, 1  ;;  %p72_p7 = scmp.eq.s32.totalorder %s67_s17, 0 }
   0xb   : > { %p529_p8 = por %p91_p5, %p90_p3  ;;  %p125_p9 = scmp.lt.s32.totalorder %s467_s11, 3 }
   0xc   : > { %s535_s19 = scalar_select %p72_p7, %s455_s8, %s74_s15  }
   0xd   : > { %p126_p10 = pnand %p323_p6, %p125_p9 }
   0xe   : > { %p153_p11 = scmp.lt.s32.totalorder (!%p126_p10), %s459_s9, 1  ;;  %s149_s25 = sand.u32 (!%p126_p10), 1, %s451_s7  }
   0xf   : > { %129 = sbr.rel (%p126_p10) target bundleno = 168 (0xa8), region = 24  ;;  %s324_s26 = sshll.u32 (!%p126_p10), %s149_s25, 4 }
  0x10   : > { %s151_s27 = scalar_lea.vmem (!%p126_p10), [#allocation2], %s324_s26  ;;  %s333_s29 = sshll.u32 (!%p126_p10), %s459_s9, 8 }
  0x11   : > { %s233_s28 = sshll.u32 (!%p126_p10), %s151_s27, 4  ;;  %s567_s3 = scalar_lea.hbm (!%p126_p10), %s615_s1, %s333_s29  ;;  %s562_s28 = int_to_ptr.vmem [resolvable:$true] %s233_s28 }
  0x12   : > { %s569_s4 = scalar_lea.sflag (!%p126_p10), [#allocation3], %s149_s25  ;;  %s391_s5 = scalar_lea.vmem (!%p126_p10), %s562_s28, 256 }
  0x13   : > { %p392_p12 = scmp.ne.s32.totalorder (!%p126_p10), %s562_s28, %s391_s5 }
  0x14   : > { %s154_s20 = scalar_select %p153_p11, %s459_s9, 1 }
  0x15   : > { %p393_p13 = pnand %p392_p12, %p522_p4  ;;  %s469_s9 = smov [#allocation2]  }
  0x16   : > { %s332_s21 = sshll.u32 %s154_s20, 7  ;;  %s395_s12 = sshll.u32 %s469_s9, 4  ;;  %s396_s12 = int_to_ptr.vmem [resolvable:$false] %s395_s12 }
  0x17   : > { %s542_s24 = scalar_lea.vmem %s614_s0, %s332_s21  ;;  %p394_p0 = pneg %p393_p13 }
  0x18   : > { %v166_v0 = vld [vmem:[%s542_s24] sm:$0xff]  ;;  %v167_v1 = vld [vmem:[%s542_s24 + $0x8] sm:$0xff]  ;;  %v168_v2 = vld [vmem:[%s542_s24 + $0x10] sm:$0xff]  ;;  %s397_s13 = scalar_lea.vmem %s396_s12, 512  ;;  %p398_p1 = scmp.lt.s32.totalorder %s562_s28, %s396_s12 }
  0x19   : > { %182 = vxpose.xlu0.b32.start [1/16] (narrow) %v166_v0, 16  ;;  %v169_v3 = vld [vmem:[%s542_s24 + $0x18] sm:$0xff]  ;;  %v170_v4 = vld [vmem:[%s542_s24 + $0x20] sm:$0xff]  ;;  %v171_v5 = vld [vmem:[%s542_s24 + $0x28] sm:$0xff]  ;;  %p399_p2 = scmp.lt.s32.totalorder %s397_s13, %s391_s5 }
  0x1a   : > { %v172_v6 = vld [vmem:[%s542_s24 + $0x30] sm:$0xff]  ;;  %v173_v7 = vld [vmem:[%s542_s24 + $0x38] sm:$0xff]  ;;  %v174_v8 = vld [vmem:[%s542_s24 + $0x40] sm:$0xff] }
  0x1b   : > { %v175_v9 = vld [vmem:[%s542_s24 + $0x48] sm:$0xff]  ;;  %v176_v10 = vld [vmem:[%s542_s24 + $0x50] sm:$0xff]  ;;  %v177_v11 = vld [vmem:[%s542_s24 + $0x58] sm:$0xff]  ;;  %p400_p3 = por %p399_p2, %p398_p1 }
  0x1c   : > { %v178_v12 = vld [vmem:[%s542_s24 + $0x60] sm:$0xff]  ;;  %v179_v13 = vld [vmem:[%s542_s24 + $0x68] sm:$0xff]  ;;  %v180_v14 = vld [vmem:[%s542_s24 + $0x70] sm:$0xff] }
  0x1d   : > { %183 = vxpose.xlu0.b32.cont [2/16] (narrow) %v167_v1, 16  ;;  %v181_v15 = vld [vmem:[%s542_s24 + $0x78] sm:$0xff]  ;;  %p401_p5 = pnand %p400_p3, %p394_p0 }
  0x21   : > { %184 = vxpose.xlu0.b32.cont [3/16] (narrow) %v168_v2, 16 }
  0x25   : > { %185 = vxpose.xlu0.b32.cont [4/16] (narrow) %v169_v3, 16 }
  0x29   : > { %186 = vxpose.xlu0.b32.cont [5/16] (narrow) %v170_v4, 16 }
  0x2d   : > { %187 = vxpose.xlu0.b32.cont [6/16] (narrow) %v171_v5, 16 }
  0x31   : > { %188 = vxpose.xlu0.b32.cont [7/16] (narrow) %v172_v6, 16 }
  0x35   : > { %189 = vxpose.xlu0.b32.cont [8/16] (narrow) %v173_v7, 16 }
  0x39   : > { %190 = vxpose.xlu0.b32.cont [9/16] (narrow) %v174_v8, 16 }
  0x3d   : > { %191 = vxpose.xlu0.b32.cont [10/16] (narrow) %v175_v9, 16 }
  0x41   : > { %192 = vxpose.xlu0.b32.cont [11/16] (narrow) %v176_v10, 16 }
  0x45   : > { %193 = vxpose.xlu0.b32.cont [12/16] (narrow) %v177_v11, 16 }
  0x49   : > { %194 = vxpose.xlu0.b32.cont [13/16] (narrow) %v178_v12, 16 }
  0x4d   : > { %195 = vxpose.xlu0.b32.cont [14/16] (narrow) %v179_v13, 16 }
  0x51   : > { %196 = vxpose.xlu0.b32.cont [15/16] (narrow) %v180_v14, 16 }
  0x55   : > { %197 = vxpose.xlu0.b32.end [16/16] (narrow) %v181_v15, 16 }
  0x95   : > { %v198_v16 = vpop.trf.xlu0 }
  0x96   : > { %214 = vst [vmem:[%s151_s27] sm:$0xff] %v198_v16 }
  0x99   : > { %v199_v17 = vpop.trf.xlu0 }
  0x9a   : > { %215 = vst [vmem:[%s151_s27 + $0x8] sm:$0xff] %v199_v17 }
  0x9b   : > { %404 = shalt.err (!%p401_p5)
}
  0x9c   : > { %s405_s15 = scalar_lea.hbm %s567_s3, 256  ;;  %s409_s21 = scalar_lea.hbm %s615_s1, 512 }
  0x9d   : > { %p406_p6 = scmp.ne.s32.totalorder %s567_s3, %s405_s15  ;;  %p410_p10 = scmp.lt.s32.totalorder %s567_s3, %s615_s1 }
  0x9e   : > { %p411_p11 = scmp.lt.s32.totalorder %s409_s21, %s405_s15 }
  0x9f   : > { %p407_p7 = pnand %p406_p6, %p522_p4 }
  0xa0   : > { %p412_p12 = por %p411_p11, %p410_p10 }
  0xa1   : > { %p408_p9 = pneg %p407_p7 }
  0xa3   : > { %p413_p13 = pnand %p412_p12, %p408_p9 }
  0xa5   : > { %416 = shalt.err (!%p413_p13)
}
  0xa6   : > { %s470_s24 = smov 128   ;;  %s471_s25 = smov 8  }
  0xa7   : > { %334 = dma.vmem_to_hbm [thread:$0]  (%p522_p4), %s562_s28, 256, %s567_s3, %s569_s4, %s470_s24, %s470_s24, %s471_s25  }
  0xa8 PF: > { %p340_p0 = scmp.ge.s32.totalorder %s467_s11, 2  ;;  %s248_s26 = sand.u32 1, %s447_s6  }
  0xa9   : > { %s249_s27 = scalar_lea.sflag [#allocation3], %s248_s26 }
  0xaa   : > { %p337_p1 = pnand %p340_p0, %p529_p8 }
  0xac   : > { %p338_p2 = pneg %p337_p1 }
  0xae   : > { %442 = dma.done.wait (%p338_p2), %s249_s27, 256  }
  0xaf   : > { %444 = vsyncadd (%p338_p2), %s249_s27, 4294967040  ;;  %s14_s11 = sadd.s32 1, %s467_s11   ;;  %s618_s6 = smov %s451_s7 }
  0xb0   : > { %p11_p3 = scmp.ge.s32.totalorder %s14_s11, 4   ;;  %s619_s7 = smov %s455_s8 }
  0xb1   : > { %s620_s8 = smov %s535_s19  ;;  %s621_s9 = smov %s463_s10 }
  0xb2   : > { %s622_s10 = smov %s624_s14  ;;  %13 = sbr.rel (!%p11_p3) target bundleno = 4 (0x4), region = 59 }
  0xb7   :  { %254 = vsyncpa [#allocation3], 1 }
  0xb8   :  { %256 = vsyncpa [#allocation3 + $0x1], 1 }

</bundles_post_ra>
